<compile_context>
chip_gen: v7x
topology: tpu7x:2x2x1
jax: 0.10.0
libtpu: 0.0.40
codegen_flags: <defaults>
</compile_context>

<pallas_src>
import functools

import jax
import jax.numpy as jnp
from jax.experimental import pallas as pl
from jax.experimental.pallas import tpu as pltpu


def _round_up(x, m):
    return (x + m - 1) // m * m


def mmaa_kernel(x_ref, csm_ref, s_ref, out_ref, *, valid_v):
    # x_ref:   (1, s_blk, T, V_pad)  data block for (modality, subject block)
    # csm_ref: (V_pad, k)            softmax(C, dim=0), precomputed, zero-padded on V
    # s_ref:   (1, s_blk, k, V_pad)  Sms block (pre-softmax, zero-padded on V)
    # out_ref: (1, 8, 128)           per-modality partial-loss tile, resident
    #                                across the subject-block grid axis
    sb = pl.program_id(1)

    @pl.when(sb == 0)
    def _():
        out_ref[...] = jnp.zeros_like(out_ref)

    _, s_blk, T, V_pad = x_ref.shape
    k = csm_ref.shape[1]

    X = x_ref[0]          # (s_blk, T, V_pad) float32
    Csm = csm_ref[...]    # (V_pad, k)
    Sm = s_ref[0]         # (s_blk, k, V_pad)

    # softmax(Sms[m, s], dim=-2): over the k axis, per (subject, voxel).
    mx = jnp.max(Sm, axis=1, keepdims=True)
    e = jnp.exp(Sm - mx)
    Ssm = e / jnp.sum(e, axis=1, keepdims=True)

    # Zero the padded V columns so they contribute nothing to A @ Ssm
    # (the corresponding X columns are already zero-padded).
    if V_pad != valid_v:
        lane = jax.lax.broadcasted_iota(jnp.int32, (1, 1, V_pad), 2)
        Ssm = jnp.where(lane < valid_v, Ssm, 0.0)

    # A = X @ softmax(C): one fused (s_blk*T, V_pad) @ (V_pad, k) MXU matmul.
    A = jnp.dot(X.reshape(s_blk * T, V_pad), Csm,
                preferred_element_type=jnp.float32)
    A3 = A.reshape(s_blk, T, k)

    # recon = A @ softmax(Sms[m, s]) per subject in the block.
    if k <= 32:
        # k is tiny: a k-term broadcast-MAC on the VPU beats a degenerate
        # (drain-latency-dominated) MXU pass with a k-deep contraction.
        recon = A3[:, :, 0:1] * Ssm[:, 0:1, :]
        for j in range(1, k):
            recon = recon + A3[:, :, j:j + 1] * Ssm[:, j:j + 1, :]
    else:
        recon = jnp.einsum("stk,skv->stv", A3, Ssm,
                           preferred_element_type=jnp.float32)

    R = X - recon
    # Accumulate the squared Frobenius norms into the resident per-modality
    # tile (scalar broadcast add over one (8,128) vreg; the HBM writeback of
    # this block happens only when the modality changes).
    out_ref[...] = out_ref[...] + jnp.sum(R * R)


def mmaa_forward(X, C, Sms, *, s_blk=None, vmem_limit_bytes=None):
    """X: (M, S, T, V), C: (V, k), Sms: (M, S, k, V) -> scalar loss (f32)."""
    M, S, T, V = X.shape
    k = C.shape[1]
    V_pad = _round_up(V, 128)

    X = X.astype(jnp.float32)
    Sms = Sms.astype(jnp.float32)

    # Hoisted: softmax(C, dim=0) is identical for every (m, s); compute once.
    Csm = jax.nn.softmax(C.astype(jnp.float32), axis=0)

    # Subject-block size: aim for >=~256 fused rows for the MXU, but keep the
    # double-buffered X + Sms blocks under a conservative VMEM budget sized
    # for v7x's 64 MiB physical VMEM (v5e/v6e have 128 MiB of headroom).
    if s_blk is None:
        rows_target = 256
        s_blk = max(1, min(S, max(1, rows_target // max(T, 1))))
        bytes_per_subject = 4 * (T * V_pad + k * V_pad)
        vmem_budget = 24 << 20
        max_by_vmem = max(1, vmem_budget // (2 * bytes_per_subject))
        s_blk = max(1, min(s_blk, max_by_vmem))
    S_pad = _round_up(S, s_blk)
    nsb = S_pad // s_blk

    # Zero padding: lane dim V -> multiple of 128, subject dim S -> multiple of
    # s_blk.  Zero X columns/rows and zero Csm rows give zero contributions to
    # A and the residual; padded softmax(Sms) columns are masked in-kernel.
    if V_pad != V:
        X = jnp.pad(X, ((0, 0), (0, 0), (0, 0), (0, V_pad - V)))
        Sms = jnp.pad(Sms, ((0, 0), (0, 0), (0, 0), (0, V_pad - V)))
        Csm = jnp.pad(Csm, ((0, V_pad - V), (0, 0)))
    if S_pad != S:
        X = jnp.pad(X, ((0, 0), (0, S_pad - S), (0, 0), (0, 0)))
        Sms = jnp.pad(Sms, ((0, 0), (0, S_pad - S), (0, 0), (0, 0)))

    # Raise the scoped VMEM limit only if an explicitly requested large block
    # needs it; cap at 64 MiB so the setting stays legal on v7x.
    if vmem_limit_bytes is None:
        need = 2 * 4 * s_blk * (T * V_pad + k * V_pad) + 4 * V_pad * k + 2 * 4 * 8 * 128
        if need > (30 << 20):
            vmem_limit_bytes = min(int(2 * need), 64 << 20)

    flops = int(4 * M * S_pad * T * k * V_pad + 3 * M * S_pad * T * V_pad)
    transcendentals = int(M * S_pad * k * V_pad)
    bytes_accessed = int(4 * (M * S_pad * T * V_pad + M * S_pad * k * V_pad
                              + V_pad * k + M * 8 * 128))

    partials = pl.pallas_call(
        functools.partial(mmaa_kernel, valid_v=V),
        out_shape=jax.ShapeDtypeStruct((M, 8, 128), jnp.float32),
        grid_spec=pltpu.PrefetchScalarGridSpec(
            num_scalar_prefetch=0,
            grid=(M, nsb),
            in_specs=[
                pl.BlockSpec((1, s_blk, T, V_pad), lambda m, sb: (m, sb, 0, 0)),
                pl.BlockSpec((V_pad, k), lambda m, sb: (0, 0)),
                pl.BlockSpec((1, s_blk, k, V_pad), lambda m, sb: (m, sb, 0, 0)),
            ],
            out_specs=pl.BlockSpec((1, 8, 128), lambda m, sb: (m, 0, 0)),
        ),
        compiler_params=pltpu.CompilerParams(
            dimension_semantics=("parallel", "arbitrary"),
            vmem_limit_bytes=vmem_limit_bytes,
        ),
        cost_estimate=pl.CostEstimate(
            flops=flops,
            transcendentals=transcendentals,
            bytes_accessed=bytes_accessed,
        ),
    )(X, Csm, Sms)

    # Per-modality partials (every element of a tile holds the same value);
    # reducing the M partials here keeps the f32 accumulation chain short.
    return jnp.sum(partials[:, 0, 0])


def mmaa_reference(X, C, Sms):
    """Plain-JAX replica of MMAA.forward for verification (f32)."""
    Csm = jax.nn.softmax(C, axis=0)
    loss = jnp.float32(0.0)
    for m in range(X.shape[0]):
        A = jnp.einsum("stv,vk->stk", X[m], Csm)             # X[m] @ softmax(C)
        Ssm = jax.nn.softmax(Sms[m], axis=-2)                 # softmax over k
        R = X[m] - jnp.einsum("stk,skv->stv", A, Ssm)
        loss = loss + jnp.sum(R * R)                          # sum of sq. Frob norms
    return loss


if __name__ == "__main__":
    # Small shapes consistent with the module's forward.
    V, T, k = 16, 8, 4
    numModalities, numSubjects = 2, 2

    key = jax.random.PRNGKey(0)
    kc, ks, kx = jax.random.split(key, 3)

    # Deterministic parameter init mirroring MMAA.__init__:
    #   C   = Softmax(dim=0)(rand(V, k))
    #   Sms = Softmax(dim=-2)(rand(M, S, k, V))
    C = jax.nn.softmax(
        jax.random.uniform(kc, (V, k), dtype=jnp.float32), axis=0)
    Sms = jax.nn.softmax(
        jax.random.uniform(ks, (numModalities, numSubjects, k, V),
                           dtype=jnp.float32), axis=-2)
    X = jax.random.uniform(kx, (numModalities, numSubjects, T, V),
                           dtype=jnp.float32)

    loss = jax.block_until_ready(mmaa_forward(X, C, Sms))
    ref = jax.block_until_ready(mmaa_reference(X, C, Sms))

    assert jnp.allclose(loss, ref, rtol=1e-4, atol=1e-4), (loss, ref)
    print("KERNEL_OK")
</pallas_src>

<mosaic_0001>
module attributes {stable_mosaic.version = 11 : i64} {
  func.func @mmaa_kernel(%arg0: i32, %arg1: i32, %arg2: memref<1x2x8x128xf32, #tpu.memory_space<vmem>>, %arg3: memref<128x4xf32, #tpu.memory_space<vmem>>, %arg4: memref<1x2x4x128xf32, #tpu.memory_space<vmem>>, %arg5: memref<1x8x128xf32, #tpu.memory_space<vmem>>) attributes {dimension_semantics = [#tpu.dimension_semantics<parallel>, #tpu.dimension_semantics<arbitrary>], iteration_bounds = array<i64: 2, 1>, scalar_prefetch = 0 : i64, scratch_operands = 0 : i64, tpu.core_type = #tpu.core_type<tc>, window_params = [{transform_indices = @transform_0, window_bounds = array<i64: 1, 2, 8, 128>}, {pipeline_mode = #tpu.pipeline_mode<synchronous>, transform_indices = @transform_1, window_bounds = array<i64: 128, 4>}, {transform_indices = @transform_2, window_bounds = array<i64: 1, 2, 4, 128>}, {transform_indices = @transform_3, window_bounds = array<i64: 1, 8, 128>}]} {
    %c0_i32 = arith.constant 0 : i32
    %0 = arith.cmpi eq, %arg1, %c0_i32 : i32
    %1 = arith.extui %0 : i1 to i32
    %c0_i32_0 = arith.constant 0 : i32
    %2 = arith.cmpi ne, %1, %c0_i32_0 : i32
    scf.if %2 {
      %cst_20 = arith.constant 0.000000e+00 : f32
      %60 = vector.broadcast %cst_20 : f32 to vector<1x8x128xf32>
      %c0_21 = arith.constant 0 : index
      %c0_22 = arith.constant 0 : index
      %c0_23 = arith.constant 0 : index
      %61 = vector.load %arg5[%c0_21, %c0_22, %c0_23] : memref<1x8x128xf32, #tpu.memory_space<vmem>>, vector<1x8x128xf32>
      tpu.vector_store %arg5[%c0_21, %c0_22, %c0_23], %60 {strides = array<i32>} : memref<1x8x128xf32, #tpu.memory_space<vmem>>, vector<1x8x128xf32>,
    } else {
    }
    %c0 = arith.constant 0 : index
    %c0_1 = arith.constant 0 : index
    %c0_2 = arith.constant 0 : index
    %c0_3 = arith.constant 0 : index
    %3 = vector.load %arg2[%c0, %c0_1, %c0_2, %c0_3] : memref<1x2x8x128xf32, #tpu.memory_space<vmem>>, vector<1x2x8x128xf32>
    %4 = vector.shape_cast %3 : vector<1x2x8x128xf32> to vector<2x8x128xf32>
    %c0_4 = arith.constant 0 : index
    %c0_5 = arith.constant 0 : index
    %5 = vector.load %arg3[%c0_4, %c0_5] : memref<128x4xf32, #tpu.memory_space<vmem>>, vector<128x4xf32>
    %c0_6 = arith.constant 0 : index
    %c0_7 = arith.constant 0 : index
    %c0_8 = arith.constant 0 : index
    %c0_9 = arith.constant 0 : index
    %6 = vector.load %arg4[%c0_6, %c0_7, %c0_8, %c0_9] : memref<1x2x4x128xf32, #tpu.memory_space<vmem>>, vector<1x2x4x128xf32>
    %7 = vector.shape_cast %6 : vector<1x2x4x128xf32> to vector<2x4x128xf32>
    %cst = arith.constant dense<0xFF800000> : vector<2x128xf32>
    %8 = vector.multi_reduction <maximumf>, %7, %cst [1] : vector<2x4x128xf32> to vector<2x128xf32>
    %9 = vector.shape_cast %8 : vector<2x128xf32> to vector<2x1x128xf32>
    %10 = vector.broadcast %9 : vector<2x1x128xf32> to vector<2x4x128xf32>
    %11 = arith.subf %7, %10 : vector<2x4x128xf32>
    %12 = math.exp %11 : vector<2x4x128xf32>
    %cst_10 = arith.constant dense<0.000000e+00> : vector<2x128xf32>
    %13 = vector.multi_reduction <add>, %12, %cst_10 [1] : vector<2x4x128xf32> to vector<2x128xf32>
    %14 = vector.shape_cast %13 : vector<2x128xf32> to vector<2x1x128xf32>
    %15 = vector.broadcast %14 : vector<2x1x128xf32> to vector<2x4x128xf32>
    %16 = arith.divf %12, %15 : vector<2x4x128xf32>
    %17 = tpu.iota {dimensions = array<i32: 2>} : vector<1x1x128xi32>
    %c16_i32 = arith.constant 16 : i32
    %18 = vector.broadcast %c16_i32 : i32 to vector<1x1x128xi32>
    %19 = arith.cmpi slt, %17, %18 : vector<1x1x128xi32>
    %cst_11 = arith.constant 0.000000e+00 : f32
    %20 = vector.shape_cast %19 : vector<1x1x128xi1> to vector<1x1x128xi1>
    %21 = vector.broadcast %20 : vector<1x1x128xi1> to vector<2x4x128xi1>
    %22 = vector.broadcast %cst_11 : f32 to vector<2x4x128xf32>
    %23 = arith.select %21, %16, %22 : vector<2x4x128xi1>, vector<2x4x128xf32>
    %24 = vector.shape_cast %4 : vector<2x8x128xf32> to vector<16x128xf32>
    %cst_12 = arith.constant dense<0.000000e+00> : vector<16x4xf32>
    %25 = tpu.matmul %24, %5, %cst_12 {dimension_numbers = #tpu.dot_dimension_numbers<[1], [0], [0], [1], [0, 0, 1, 1], [], []>} : vector<16x128xf32>, vector<128x4xf32>, vector<16x4xf32> -> vector<16x4xf32>
    %26 = vector.shape_cast %25 : vector<16x4xf32> to vector<2x8x4xf32>
    %27 = vector.extract_strided_slice %26 {offsets = [0, 0, 0], sizes = [2, 8, 1], strides = [1, 1, 1]} : vector<2x8x4xf32> to vector<2x8x1xf32>
    %28 = vector.extract_strided_slice %23 {offsets = [0, 0, 0], sizes = [2, 1, 128], strides = [1, 1, 1]} : vector<2x4x128xf32> to vector<2x1x128xf32>
    %29 = vector.broadcast %27 : vector<2x8x1xf32> to vector<2x8x128xf32>
    %30 = vector.broadcast %28 : vector<2x1x128xf32> to vector<2x8x128xf32>
    %31 = arith.mulf %29, %30 : vector<2x8x128xf32>
    %32 = vector.extract_strided_slice %26 {offsets = [0, 0, 1], sizes = [2, 8, 1], strides = [1, 1, 1]} : vector<2x8x4xf32> to vector<2x8x1xf32>
    %33 = vector.extract_strided_slice %23 {offsets = [0, 1, 0], sizes = [2, 1, 128], strides = [1, 1, 1]} : vector<2x4x128xf32> to vector<2x1x128xf32>
    %34 = vector.broadcast %32 : vector<2x8x1xf32> to vector<2x8x128xf32>
    %35 = vector.broadcast %33 : vector<2x1x128xf32> to vector<2x8x128xf32>
    %36 = arith.mulf %34, %35 : vector<2x8x128xf32>
    %37 = arith.addf %31, %36 : vector<2x8x128xf32>
    %38 = vector.extract_strided_slice %26 {offsets = [0, 0, 2], sizes = [2, 8, 1], strides = [1, 1, 1]} : vector<2x8x4xf32> to vector<2x8x1xf32>
    %39 = vector.extract_strided_slice %23 {offsets = [0, 2, 0], sizes = [2, 1, 128], strides = [1, 1, 1]} : vector<2x4x128xf32> to vector<2x1x128xf32>
    %40 = vector.broadcast %38 : vector<2x8x1xf32> to vector<2x8x128xf32>
    %41 = vector.broadcast %39 : vector<2x1x128xf32> to vector<2x8x128xf32>
    %42 = arith.mulf %40, %41 : vector<2x8x128xf32>
    %43 = arith.addf %37, %42 : vector<2x8x128xf32>
    %44 = vector.extract_strided_slice %26 {offsets = [0, 0, 3], sizes = [2, 8, 1], strides = [1, 1, 1]} : vector<2x8x4xf32> to vector<2x8x1xf32>
    %45 = vector.extract_strided_slice %23 {offsets = [0, 3, 0], sizes = [2, 1, 128], strides = [1, 1, 1]} : vector<2x4x128xf32> to vector<2x1x128xf32>
    %46 = vector.broadcast %44 : vector<2x8x1xf32> to vector<2x8x128xf32>
    %47 = vector.broadcast %45 : vector<2x1x128xf32> to vector<2x8x128xf32>
    %48 = arith.mulf %46, %47 : vector<2x8x128xf32>
    %49 = arith.addf %43, %48 : vector<2x8x128xf32>
    %50 = arith.subf %4, %49 : vector<2x8x128xf32>
    %c0_13 = arith.constant 0 : index
    %c0_14 = arith.constant 0 : index
    %c0_15 = arith.constant 0 : index
    %51 = vector.load %arg5[%c0_13, %c0_14, %c0_15] : memref<1x8x128xf32, #tpu.memory_space<vmem>>, vector<1x8x128xf32>
    %52 = arith.mulf %50, %50 : vector<2x8x128xf32>
    %53 = vector.shape_cast %52 : vector<2x8x128xf32> to vector<1x2x8x128xf32>
    %cst_16 = arith.constant dense<0.000000e+00> : vector<1xf32>
    %54 = vector.multi_reduction <add>, %53, %cst_16 [1, 2, 3] : vector<1x2x8x128xf32> to vector<1xf32>
    %55 = vector.shape_cast %54 : vector<1xf32> to vector<1x1x1x1xf32>
    %56 = vector.extract %55[0, 0, 0, 0] : f32 from vector<1x1x1x1xf32>
    %57 = vector.broadcast %56 : f32 to vector<1x8x128xf32>
    %58 = arith.addf %51, %57 : vector<1x8x128xf32>
    %c0_17 = arith.constant 0 : index
    %c0_18 = arith.constant 0 : index
    %c0_19 = arith.constant 0 : index
    %59 = vector.load %arg5[%c0_17, %c0_18, %c0_19] : memref<1x8x128xf32, #tpu.memory_space<vmem>>, vector<1x8x128xf32>
    tpu.vector_store %arg5[%c0_17, %c0_18, %c0_19], %58 {strides = array<i32>} : memref<1x8x128xf32, #tpu.memory_space<vmem>>, vector<1x8x128xf32>,
    return
  }
  func.func @transform_0(%arg0: i32, %arg1: i32) -> (i32, i32, i32, i32) {
    %c0_i32 = arith.constant 0 : i32
    %c0_i32_0 = arith.constant 0 : i32
    %c0_i32_1 = arith.constant 0 : i32
    return %arg0, %arg1, %c0_i32, %c0_i32_0 : i32, i32, i32, i32
  }
  func.func @transform_1(%arg0: i32, %arg1: i32) -> (i32, i32) {
    %c0_i32 = arith.constant 0 : i32
    %c0_i32_0 = arith.constant 0 : i32
    %c0_i32_1 = arith.constant 0 : i32
    return %c0_i32, %c0_i32_0 : i32, i32
  }
  func.func @transform_2(%arg0: i32, %arg1: i32) -> (i32, i32, i32, i32) {
    %c0_i32 = arith.constant 0 : i32
    %c0_i32_0 = arith.constant 0 : i32
    %c0_i32_1 = arith.constant 0 : i32
    return %arg0, %arg1, %c0_i32, %c0_i32_0 : i32, i32, i32, i32
  }
  func.func @transform_3(%arg0: i32, %arg1: i32) -> (i32, i32, i32) {
    %c0_i32 = arith.constant 0 : i32
    %c0_i32_0 = arith.constant 0 : i32
    %c0_i32_1 = arith.constant 0 : i32
    return %arg0, %c0_i32, %c0_i32_0 : i32, i32, i32
  }
}

</mosaic_0001>

<bundles_post_ra>
// kernel: tpu_custom_call.1
= control target key start
LH: loop header
LB: loop body
LE: loop exit
PB: predicated region body
PF: predicated region fallthrough
CT: control target
= control target key end

     0   :  { %8 = vsyncpa [#allocation3], 0  ;;  %s1048_s0 = inlined_call_operand.vmem [shape: f32[2,2,8,128], index: 0, kind: input, shape index: {}]   ;;  %s1049_s1 = inlined_call_operand.vmem [shape: f32[128,4], index: 1, kind: input, shape index: {}]   ;;  %s1050_s2 = inlined_call_operand.vmem [shape: f32[2,2,4,128], index: 2, kind: input, shape index: {}]   ;;  %s1051_s3 = inlined_call_operand.hbm [shape: f32[2,8,128], index: 3, kind: output, shape index: {}]  }
   0x1   :  { %10 = vsyncpa [#allocation3 + $0x1], 0  ;;  %s865_s12 = smov 0   ;;  %s867_s13 = smov 0  }
   0x2   :  { %s869_s14 = smov 0   ;;  %s871_s15 = smov 0  }
   0x3   :  { %s873_s16 = smov 0   ;;  %s875_s17 = smov 0  }
   0x4 LB: > { %s582_s18 = sadd.s32 4294967295, %s838_s17   ;;  %s583_s19 = sadd.s32 4294967294, %s838_s17   ;;  %s838_s17 = sphi %s875_s17, %s16_s17   ;;  %s834_s16 = sphi %s873_s16, %s1058_s16   ;;  %s830_s15 = sphi %s871_s15, %s1057_s15   ;;  %s826_s14 = sphi %s869_s14, %s1056_s14   ;;  %s822_s13 = sphi %s867_s13, %s1055_s13   ;;  %s818_s12 = sphi %s865_s12, %s1054_s12  }
   0x5   : > { %s28_s20 = sadd.s32 1, %s834_s16  ;;  %s112_s21 = sadd.s32 1, %s826_s14 }
   0x6   : > { %p30_p0 = scmp.ge.s32.totalorder %s28_s20, 2  ;;  %p122_p1 = scmp.ne.s32.totalorder %s826_s14, %s822_s13 }
   0x7   : > { %p123_p2 = scmp.eq.s32.totalorder %s582_s18, 1  ;;  %p128_p3 = scmp.ne.s32.totalorder %s822_s13, %s818_s12 }
   0x8   : > { %s1060_s20 = smov (%p30_p0, %s28_s20), 0  ;;  %p129_p5 = scmp.eq.s32.totalorder %s583_s19, 1 }
   0x9   : > { %p905_p4 = por %p123_p2, %p122_p1  ;;  %s109_s23 = ssub.s32 %s834_s16, %s1060_s20 }
   0xa   : > { %p586_p6 = scmp.ge.s32.totalorder %s838_s17, 1  ;;  %p110_p7 = scmp.eq.s32.totalorder %s109_s23, 0 }
   0xb   : > { %p912_p8 = por %p129_p5, %p128_p3  ;;  %p176_p9 = scmp.lt.s32.totalorder %s838_s17, 3 }
   0xc   : > { %s918_s25 = scalar_select %p110_p7, %s826_s14, %s112_s21  }
   0xd   : > { %p177_p10 = pnand %p586_p6, %p176_p9 }
   0xe   : > { %v240_v0 = vld [vmem:[%s1049_s1] sm:$0xff] (!%p177_p10)  ;;  %v241_v1 = vld [vmem:[%s1049_s1 + $0x8] sm:$0xff] (!%p177_p10)  ;;  %v242_v2 = vld [vmem:[%s1049_s1 + $0x10] sm:$0xff] (!%p177_p10)  ;;  %p214_p11 = scmp.lt.s32.totalorder (!%p177_p10), %s830_s15, 1  ;;  %v840_v5 = vmov (!%p177_p10), 1   ;;  %v841_v9 = vmov (!%p177_p10), 0  }
   0xf   : > { %180 = sbr.rel (%p177_p10) target bundleno = 633 (0x279), region = 32  ;;  %v651_v3 = vpack.c.bf16 (!%p177_p10), %v241_v1, %v240_v0  ;;  %v243_v4 = vld [vmem:[%s1049_s1 + $0x18] sm:$0xff] (!%p177_p10)  ;;  %746 = vset.pattern.permute.xlu1 (!%p177_p10), %v840_v5  ;;  %v244_v7 = vld [vmem:[%s1049_s1 + $0x20] sm:$0xff] (!%p177_p10)  ;;  %v245_v8 = vld [vmem:[%s1049_s1 + $0x28] sm:$0xff] (!%p177_p10)  ;;  %745 = vset.pattern.permute.xlu0 (!%p177_p10), %v841_v9  ;;  %v842_v30 = vmov (!%p177_p10), 2   ;;  %v843_v31 = vmov (!%p177_p10), 3  }
  0x10   : > { %v655_v6 = vpack.c.bf16 (!%p177_p10), %v243_v4, %v242_v2  ;;  %v659_v10 = vpack.c.bf16 (!%p177_p10), %v245_v8, %v244_v7  ;;  %v246_v11 = vld [vmem:[%s1049_s1 + $0x30] sm:$0xff] (!%p177_p10)  ;;  %v247_v12 = vld [vmem:[%s1049_s1 + $0x38] sm:$0xff] (!%p177_p10)  ;;  %v248_v15 = vld [vmem:[%s1049_s1 + $0x40] sm:$0xff] (!%p177_p10)  ;;  %vm258_vm0 = vcmask (!%p177_p10), 1043456   ;;  %v297_v4 = vlaneseq (!%p177_p10)  ;;  %s593_s8 = sshll.u32 (!%p177_p10), %s830_s15, 7 }
  0x11   : > { %652 = vmatprep.subr.bf16.mxu0 (!%p177_p10), %v651_v3  ;;  %v663_v14 = vpack.c.bf16 (!%p177_p10), %v247_v12, %v246_v11  ;;  %v249_v16 = vld [vmem:[%s1049_s1 + $0x48] sm:$0xff] (!%p177_p10)  ;;  %v250_v18 = vld [vmem:[%s1049_s1 + $0x50] sm:$0xff] (!%p177_p10)  ;;  %v251_v19 = vld [vmem:[%s1049_s1 + $0x58] sm:$0xff] (!%p177_p10)  ;;  %s1001_s26 = scalar_lea.hbm (!%p177_p10), %s1051_s3, %s593_s8 }
  0x12   : > { %654 = vmatpush3.bf16.msra.mxu0 (!%p177_p10), %v651_v3  ;;  %v667_v17 = vpack.c.bf16 (!%p177_p10), %v249_v16, %v248_v15  ;;  %v671_v20 = vpack.c.bf16 (!%p177_p10), %v251_v19, %v250_v18  ;;  %v252_v21 = vld [vmem:[%s1049_s1 + $0x60] sm:$0xff] (!%p177_p10)  ;;  %v253_v22 = vld [vmem:[%s1049_s1 + $0x68] sm:$0xff] (!%p177_p10)  ;;  %v254_v24 = vld [vmem:[%s1049_s1 + $0x70] sm:$0xff] (!%p177_p10)  ;;  %v390_v8 = vshrl.u32 (!%p177_p10), %v297_v4, 7 }
  0x13   : > { %656 = vmatprep.subr.bf16.mxu0 (!%p177_p10), %v655_v6  ;;  %v675_v23 = vpack.c.bf16 (!%p177_p10), %v253_v22, %v252_v21  ;;  %v255_v25 = vld [vmem:[%s1049_s1 + $0x78] sm:$0xff] (!%p177_p10) }
  0x14   : > { %v679_v26 = vpack.c.bf16 (!%p177_p10), %v255_v25, %v254_v24  ;;  %v391_v15 = vsub.s32 (!%p177_p10), 0, %v390_v8 }
  0x16   : > { %s940_s11 = scalar_select %p214_p11, %s830_s15, 1  ;;  %658 = vmatpush3.bf16.msra.mxu0 %v655_v6  ;;  %v298_v6 = vand.u32 127, %v297_v4 }
  0x17   : > { %660 = vmatprep.subr.bf16.mxu0 %v659_v10  ;;  %s844_s15 = smov [#allocation2]  }
  0x18   : > { %s596_s18 = sshll.u32 %s940_s11, 4  ;;  %vm299_vm1 = vcmp.lt.s32.totalorder %v298_v6, 16  ;;  %s764_s29 = sshll.u32 %s844_s15, 4  ;;  %s765_s29 = int_to_ptr.vmem [resolvable:$false] %s764_s29 }
  0x19   : > { %s946_s23 = scalar_lea.vmem %s1048_s0, %s596_s18  ;;  %s766_s30 = scalar_lea.vmem %s765_s29, 256 }
  0x1a   : > { %v955_v13 = vld [vmem:[%s946_s23] sm:$0xff]  ;;  %662 = vmatpush3.bf16.msra.mxu0 %v659_v10  ;;  %v983_v27 = vld [vmem:[%s946_s23 + $0x8] sm:$0xff]  ;;  %s597_s23 = sshll.u32 %s940_s11, 3  ;;  %s210_s11 = sand.u32 1, %s822_s13  }
  0x1b   : > { %648 = vmatprep.mubr.f32.mxu0 %v955_v13  ;;  %664 = vmatprep.subr.bf16.mxu0 %v663_v14  ;;  %s231_s6 = scalar_lea.vmem %s1050_s2, %s597_s23  ;;  %s587_s7 = sshll.u32 %s210_s11, 3 }
  0x1c   : > { %v257_v32 = vld [vmem:[%s231_s6 + $0x4] sm:$0xf]  ;;  %v256_v33 = vld [vmem:[%s231_s6] sm:$0xf]  ;;  %s212_s9 = scalar_lea.vmem [#allocation2], %s587_s7  ;;  %s478_s27 = scalar_lea.sflag [#allocation3], %s210_s11 }
  0x1d   : > { %v266_v34 = vsel %vm258_vm0, %v257_v32, -inf  ;;  %v259_v35 = vsel %vm258_vm0, %v256_v33, -inf  ;;  %s491_s10 = sshll.u32 %s212_s9, 4  ;;  %s1003_s10 = int_to_ptr.vmem [resolvable:$true] %s491_s10 }
  0x1e   : > { %666 = vmatpush3.bf16.msra.mxu0 %v663_v14  ;;  %v267_v36 = vrot.slane %v266_v34, 4  ;;  %v260_v37 = vrot.slane %v259_v35, 4  ;;  %v409_v14 = vsub.s32 1, %v390_v8  ;;  %s760_s28 = scalar_lea.vmem %s1003_s10, 128  ;;  %p767_p1 = scmp.lt.s32.totalorder %s1003_s10, %s765_s29 }
  0x1f   : > { %668 = vmatprep.subr.bf16.mxu0 %v667_v17  ;;  %p761_p12 = scmp.ne.s32.totalorder %s1003_s10, %s760_s28  ;;  %p768_p2 = scmp.lt.s32.totalorder %s766_s30, %s760_s28 }
  0x20   : > { %v268_v38 = vmax.f32 %v266_v34, %v267_v36  ;;  %v261_v39 = vmax.f32 %v259_v35, %v260_v37 }
  0x21   : > { %p762_p13 = pnand %p761_p12, %p905_p4  ;;  %p769_p3 = por %p768_p2, %p767_p1 }
  0x22   : > { %670 = vmatpush3.bf16.msra.mxu0 %v667_v17  ;;  %v269_v40 = vrot.slane %v268_v38, 2  ;;  %v262_v41 = vrot.slane %v261_v39, 2  ;;  %v429_v17 = vsub.s32 2, %v390_v8 }
  0x23   : > { %672 = vmatprep.subr.bf16.mxu0 %v671_v20  ;;  %p763_p0 = pneg %p762_p13 }
  0x24   : > { %v270_v42 = vmax.f32 %v268_v38, %v269_v40  ;;  %v263_v43 = vmax.f32 %v261_v39, %v262_v41 }
  0x25   : > { %p770_p5 = pnand %p769_p3, %p763_p0 }
  0x26   : > { %674 = vmatpush3.bf16.msra.mxu0 %v671_v20  ;;  %v271_v44 = vrot.slane %v270_v42, 1  ;;  %v264_v45 = vrot.slane %v263_v43, 1 }
  0x27   : > { %676 = vmatprep.subr.bf16.mxu0 %v675_v23 }
  0x28   : > { %v272_v46 = vmax.f32 %v270_v42, %v271_v44  ;;  %v265_v47 = vmax.f32 %v263_v43, %v264_v45 }
  0x2a   : > { %678 = vmatpush3.bf16.msra.mxu0 %v675_v23  ;;  %v274_v48 = vsub.f32 %v257_v32, %v272_v46  ;;  %v273_v49 = vsub.f32 %v256_v33, %v265_v47 }
  0x2b   : > { %680 = vmatprep.subr.bf16.mxu0 %v679_v26 }
  0x2c   : > { %v277_v50 = vmul.f32 1.442695, %v274_v48  ;;  %v275_v51 = vmul.f32 1.442695, %v273_v49 }
  0x2e   : > { %682 = vmatpush3.bf16.msra.mxu0 %v679_v26  ;;  %752 = vpow2.f32 %v277_v50  ;;  %v449_v26 = vsub.s32 3, %v390_v8 }
  0x2f   : > { %754 = vpow2.f32 %v275_v51 }
  0x31   : > { %649 = vmatmul.mubr.f32.vlgmr.msra.gmra.mrb[0].mxu0 %v983_v27 }
  0x38   : > { %v753_v52 = vpop.eup %752 }
  0x39   : > { %v755_v53 = vpop.eup %754  ;;  %v286_v54 = vsel %vm258_vm0, %v753_v52, 0.0 }
  0x3a   : > { %v279_v55 = vsel %vm258_vm0, %v755_v53, 0.0  ;;  %v287_v56 = vrot.slane %v286_v54, 4 }
  0x3b   : > { %v280_v57 = vrot.slane %v279_v55, 4 }
  0x3c   : > { %v288_v58 = vadd.f32 %v287_v56, %v286_v54 }
  0x3d   : > { %v281_v59 = vadd.f32 %v280_v57, %v279_v55 }
  0x3e   : > { %v289_v60 = vrot.slane %v288_v58, 2 }
  0x3f   : > { %v282_v61 = vrot.slane %v281_v59, 2 }
  0x40   : > { %v290_v62 = vadd.f32 %v289_v60, %v288_v58 }
  0x41   : > { %v283_v63 = vadd.f32 %v282_v61, %v281_v59 }
  0x42   : > { %v291_v0 = vrot.slane %v290_v62, 1 }
  0x43   : > { %v284_v1 = vrot.slane %v283_v63, 1 }
  0x44   : > { %v292_v2 = vadd.f32 %v291_v0, %v290_v62 }
  0x45   : > { %v285_v3 = vadd.f32 %v284_v1, %v283_v63 }
  0x46   : > { %756 = vrcp.f32 %v292_v2 }
  0x47   : > { %758 = vrcp.f32 %v285_v3 }
 0x104   : > { %v650_v28 = vpop.f32.mrb[0].mxu0 }
 0x105   : > { %404 = vperm.xlu1 %746, %v650_v28   ;;  %386 = vperm.xlu0 %745, %v650_v28   ;;  %v370_v29 = vpop.f32.mrb[1].mxu0 }
 0x109   : > { %747 = vset.pattern.permute.xlu1 %v842_v30  ;;  %381 = vperm.xlu0 %745, %v370_v29  }
 0x10a   : > { %424 = vperm.xlu1 %747, %v650_v28  }
 0x10d   : > { %749 = vset.pattern.permute.xlu0 %v842_v30 }
 0x10e   : > { %748 = vset.pattern.permute.xlu1 %v840_v5  ;;  %420 = vperm.xlu0 %749, %v370_v29   ;;  %v757_v5 = vpop.eup %756 }
 0x10f   : > { %400 = vperm.xlu1 %748, %v370_v29   ;;  %v759_v7 = vpop.eup %758  ;;  %v296_v9 = vmul.f32 %v757_v5, %v753_v52 }
 0x110   : > { %v294_v12 = vmul.f32 %v759_v7, %v755_v53 }
 0x111   : > { %v303_v16 = vsel %vm299_vm1, %v296_v9, 0.0 }
 0x112   : > { %751 = vset.pattern.permute.xlu0 %v843_v31  ;;  %v302_v18 = vsel %vm299_vm1, %v294_v12, 0.0  ;;  %v414_v20 = vrot.slane %v303_v16, %v409_v14  ;;  %v396_v21 = vrot.slane %v303_v16, %v391_v15  ;;  %v434_v24 = vrot.slane %v303_v16, %v429_v17 }
 0x113   : > { %750 = vset.pattern.permute.xlu1 %v843_v31  ;;  %444 = vperm.xlu0 %751, %v650_v28   ;;  %v392_v23 = vrot.slane %v302_v18, %v391_v15  ;;  %v410_v25 = vrot.slane %v302_v18, %v409_v14  ;;  %v430_v30 = vrot.slane %v302_v18, %v429_v17 }
 0x114   : > { %440 = vperm.xlu1 %750, %v370_v29   ;;  %v454_v36 = vrot.slane %v303_v16, %v449_v26  ;;  %v450_v37 = vrot.slane %v302_v18, %v449_v26 }
 0x184   : > { %v405_v10 = vpop.permute.xlu1 %404  ;;  %v387_v11 = vpop.permute.xlu0 %386 }
 0x185   : > { %v416_v28 = vmul.f32 %v414_v20, %v405_v10  ;;  %v398_v29 = vmul.f32 %v396_v21, %v387_v11 }
 0x187   : > { %v418_v38 = vadd.f32 %v416_v28, %v398_v29 }
 0x188   : > { %v382_v19 = vpop.permute.xlu0 %381 }
 0x189   : > { %v425_v22 = vpop.permute.xlu1 %424  ;;  %v397_v33 = vmul.f32 %v392_v23, %v382_v19 }
 0x18a   : > { %v436_v34 = vmul.f32 %v434_v24, %v425_v22 }
 0x18c   : > { %v438_v42 = vadd.f32 %v436_v34, %v418_v38 }
 0x18d   : > { %v421_v31 = vpop.permute.xlu0 %420 }
 0x18e   : > { %v401_v32 = vpop.permute.xlu1 %400  ;;  %v435_v39 = vmul.f32 %v430_v30, %v421_v31 }
 0x18f   : > { %v415_v35 = vmul.f32 %v410_v25, %v401_v32 }
 0x191   : > { %v417_v40 = vadd.f32 %v415_v35, %v397_v33 }
 0x192   : > { %v445_v41 = vpop.permute.xlu0 %444 }
 0x193   : > { %v456_v43 = vmul.f32 %v454_v36, %v445_v41  ;;  %v441_v44 = vpop.permute.xlu1 %440  ;;  %v437_v45 = vadd.f32 %v435_v39, %v417_v40 }
 0x194   : > { %v455_v46 = vmul.f32 %v450_v37, %v441_v44 }
 0x195   : > { %v458_v47 = vadd.f32 %v456_v43, %v438_v42 }
 0x196   : > { %v457_v48 = vadd.f32 %v455_v46, %v437_v45 }
 0x197   : > { %v460_v49 = vsub.f32 %v983_v27, %v458_v47 }
 0x198   : > { %v459_v50 = vsub.f32 %v955_v13, %v457_v48 }
 0x199   : > { %v463_v51 = vmul.f32 %v460_v49, %v460_v49 }
 0x19a   : > { %v462_v52 = vmul.f32 %v459_v50, %v459_v50 }
 0x19c   : > { %v464_v53 = vadd.f32 %v463_v51, %v462_v52 }
 0x19e   : > { %465 = vadd.xlane.f32.xlu1 %v464_v53 }
 0x22b   : > { %v466_v54 = vpop.xlane.xlu1 %465 }
 0x22c   : > { %v467_v55 = vrot.slane %v466_v54, 4 }
 0x22e   : > { %v468_v56 = vadd.f32 %v467_v55, %v466_v54 }
 0x230   : > { %v469_v57 = vrot.slane %v468_v56, 2 }
 0x232   : > { %v470_v58 = vadd.f32 %v469_v57, %v468_v56 }
 0x234   : > { %v471_v59 = vrot.slane %v470_v58, 1 }
 0x236   : > { %v472_v60 = vadd.f32 %v471_v59, %v470_v58 }
 0x238   : > { %683 = vpush %v472_v60 }
 0x269   : > { %s684_s18 = spop %683 }
 0x26a   : > { %v474_v13 = vstv %s684_s18 }
 0x26b   : > { %476 = vst [vmem:[%s212_s9] sm:$0xff] %v474_v13 }
 0x26c   : > { %773 = shalt.err (!%p770_p5)
}
 0x26d   : > { %s774_s23 = scalar_lea.hbm %s1001_s26, 128  ;;  %s778_s6 = scalar_lea.hbm %s1051_s3, 256 }
 0x26e   : > { %p775_p6 = scmp.ne.s32.totalorder %s1001_s26, %s774_s23  ;;  %p779_p10 = scmp.lt.u32.totalorder %s1001_s26, %s1051_s3 }
 0x26f   : > { %p780_p11 = scmp.lt.u32.totalorder %s778_s6, %s774_s23  ;;  %p782_p13 = scmp.lt.u32.totalorder %s774_s23, %s1001_s26 }
 0x270   : > { %p776_p7 = pnand %p775_p6, %p905_p4 }
 0x271   : > { %p781_p12 = por %p780_p11, %p779_p10 }
 0x272   : > { %p777_p9 = pneg %p776_p7 }
 0x273   : > { %p783_p0 = por %p782_p13, %p781_p12 }
 0x275   : > { %p784_p1 = pnand %p783_p0, %p777_p9 }
 0x277   : > { %787 = shalt.err (!%p784_p1)
}
 0x278   : > { %685 = dma.vmem_to_hbm [thread:$0]  (%p905_p4), %s1003_s10, 128, %s1001_s26, %s478_s27  }
 0x279 PF: > { %p691_p2 = scmp.ge.s32.totalorder %s838_s17, 2  ;;  %s503_s8 = sand.u32 1, %s818_s12  }
 0x27a   : > { %s504_s9 = scalar_lea.sflag [#allocation3], %s503_s8 }
 0x27b   : > { %p688_p3 = pnand %p691_p2, %p912_p8 }
 0x27d   : > { %813 = dma.done.wait (!%p688_p3), %s504_s9, 128  }
 0x27e   : > { %815 = vsyncadd (!%p688_p3), %s504_s9, 4294967168  ;;  %s16_s17 = sadd.s32 1, %s838_s17   ;;  %s1054_s12 = smov %s822_s13 }
 0x27f   : > { %p13_p5 = scmp.ge.s32.totalorder %s16_s17, 4   ;;  %s1055_s13 = smov %s826_s14 }
 0x280   : > { %s1056_s14 = smov %s918_s25  ;;  %s1057_s15 = smov %s834_s16 }
 0x281   : > { %s1058_s16 = smov %s1060_s20  ;;  %15 = sbr.rel (!%p13_p5) target bundleno = 4 (0x4), region = 74 }
 0x288   :  { %509 = vsyncpa [#allocation3], 1 }
 0x289   :  { %511 = vsyncpa [#allocation3 + $0x1], 1 }

</bundles_post_ra>
